<compile_context>
chip_gen: v7x
topology: tpu7x:2x2x1
jax: 0.10.0
libtpu: 0.0.40
codegen_flags: <defaults>
</compile_context>

<pallas_src>
import functools

import jax
import jax.numpy as jnp
from jax.experimental import pallas as pl
from jax.experimental.pallas import tpu as pltpu

LANE = 128   # vreg lane width
SUB = 8      # vreg sublane count


def _qloss_kernel(x_ref, o_ref, acc_ref, *, inv_n):
    """Grid = (partials, steps).

    Axis 0 ("parallel") splits the row range so a 2-TC chip (v7x) shards the
    reduction; axis 1 ("arbitrary") walks this partial's row tiles and
    accumulates into a full-tile VMEM scratch.  Only on the last inner step do
    we fold the accumulator to (8, 128), scale by 1/N and write it out.
    """
    i = pl.program_id(1)

    @pl.when(i == 0)
    def _():
        acc_ref[...] = jnp.zeros_like(acc_ref)

    x = x_ref[...].astype(jnp.float32)          # cast in-kernel only
    eps = jnp.float32(1e-20)
    acc_ref[...] += -(x * jnp.log(x + eps)
                      + (1.0 - x) * jnp.log(1.0 - x + eps))

    @pl.when(i == pl.num_programs(1) - 1)
    def _():
        # Fold (tm, 128) -> (tm//8, 8, 128) -> (8, 128): vreg-wise VPU adds,
        # no scalar XLU reduction inside the kernel.
        folded = acc_ref[...].reshape(-1, SUB, LANE).sum(axis=0)
        o_ref[...] = folded * jnp.float32(inv_n)


def quantization_loss(x, *, tm=512):
    """Pallas TPU implementation of Quantization_Loss.forward (global mean)."""
    n = x.size
    rows = -(-n // LANE)                            # cdiv(n, 128)

    # --- tile / grid sizing --------------------------------------------------
    total_steps = -(-rows // tm)
    num_partials = 2 if total_steps >= 2 else 1     # both TCs on v7x; serial
                                                    # loop on v5e/v6e
    steps = -(-total_steps // num_partials)
    tm_eff = -(-rows // (num_partials * steps))     # shrink tile -> minimal pad
    tm_eff = -(-tm_eff // SUB) * SUB                # sublane multiple
    rows_padded = num_partials * steps * tm_eff
    # block = tm_eff x 128 f32 <= ~260 KiB, double-buffered: tiny vs 64 MiB
    # VMEM on v7x (128 MiB on v5e/v6e) -> no vmem_limit override needed.

    xf = jnp.ravel(x)
    pad = rows_padded * LANE - n
    if pad:
        # Only hit for ragged sizes (not the test shape).  Zero padding
        # contributes exactly 0 because the entropy is evaluated in f32 with
        # eps=1e-20 (0*log(1e-20) = 0 and log(1 + 1e-20) == 0 in f32).
        xf = jnp.pad(xf, (0, pad))
    x2 = xf.reshape(rows_padded, LANE)

    kernel = functools.partial(_qloss_kernel, inv_n=1.0 / n)

    out = pl.pallas_call(
        kernel,
        out_shape=jax.ShapeDtypeStruct((num_partials * SUB, LANE), jnp.float32),
        grid_spec=pltpu.PrefetchScalarGridSpec(
            num_scalar_prefetch=0,
            grid=(num_partials, steps),
            in_specs=[pl.BlockSpec((tm_eff, LANE),
                                   lambda p, i: (p * steps + i, 0))],
            out_specs=pl.BlockSpec((SUB, LANE), lambda p, i: (p, 0)),
            scratch_shapes=[pltpu.VMEM((tm_eff, LANE), jnp.float32)],
        ),
        compiler_params=pltpu.CompilerParams(
            dimension_semantics=("parallel", "arbitrary")),
    )(x2)

    # Every element of `out` already carries the 1/N factor; the tiny final
    # reduction (num_partials * 8 * 128 values) is left to XLA.
    return jnp.sum(out)


def quantization_loss_ref(x):
    x = x.astype(jnp.float32)
    eps = 1e-20
    loss = -(x * jnp.log(x + eps) + (1.0 - x) * jnp.log(1.0 - x + eps))
    return jnp.mean(loss)


if __name__ == "__main__":
    key = jax.random.PRNGKey(0)
    # Typical "soft hash bits" input: values in (0, 1), NCHW-style shape.
    x = jax.random.uniform(key, (2, 4, 16, 16), dtype=jnp.float32)

    loss = jax.block_until_ready(quantization_loss(x))
    ref = jax.block_until_ready(quantization_loss_ref(x))

    assert jnp.allclose(loss, ref, rtol=1e-5, atol=1e-6), (loss, ref)
    print("KERNEL_OK")
</pallas_src>

<mosaic_0001>
module attributes {stable_mosaic.version = 11 : i64} {
  func.func @_qloss_kernel(%arg0: i32, %arg1: i32, %arg2: memref<16x128xf32, #tpu.memory_space<vmem>>, %arg3: memref<8x128xf32, #tpu.memory_space<vmem>>, %arg4: memref<16x128xf32, #tpu.memory_space<vmem>>) attributes {dimension_semantics = [#tpu.dimension_semantics<parallel>, #tpu.dimension_semantics<arbitrary>], iteration_bounds = array<i64: 1, 1>, scalar_prefetch = 0 : i64, scratch_operands = 1 : i64, tpu.core_type = #tpu.core_type<tc>, window_params = [{transform_indices = @transform_0, window_bounds = array<i64: 16, 128>}, {transform_indices = @transform_1, window_bounds = array<i64: 8, 128>}]} {
    %c0_i32 = arith.constant 0 : i32
    %0 = arith.cmpi eq, %arg1, %c0_i32 : i32
    %1 = arith.extui %0 : i1 to i32
    %c0_i32_0 = arith.constant 0 : i32
    %2 = arith.cmpi ne, %1, %c0_i32_0 : i32
    scf.if %2 {
      %cst_12 = arith.constant 0.000000e+00 : f32
      %25 = vector.broadcast %cst_12 : f32 to vector<16x128xf32>
      %c0_13 = arith.constant 0 : index
      %c0_14 = arith.constant 0 : index
      %26 = vector.load %arg4[%c0_13, %c0_14] : memref<16x128xf32, #tpu.memory_space<vmem>>, vector<16x128xf32>
      tpu.vector_store %arg4[%c0_13, %c0_14], %25 {strides = array<i32>} : memref<16x128xf32, #tpu.memory_space<vmem>>, vector<16x128xf32>,
    } else {
    }
    %c0 = arith.constant 0 : index
    %c0_1 = arith.constant 0 : index
    %3 = vector.load %arg2[%c0, %c0_1] : memref<16x128xf32, #tpu.memory_space<vmem>>, vector<16x128xf32>
    %c0_2 = arith.constant 0 : index
    %c0_3 = arith.constant 0 : index
    %4 = vector.load %arg4[%c0_2, %c0_3] : memref<16x128xf32, #tpu.memory_space<vmem>>, vector<16x128xf32>
    %cst = arith.constant 9.99999968E-21 : f32
    %5 = vector.broadcast %cst : f32 to vector<16x128xf32>
    %6 = arith.addf %3, %5 : vector<16x128xf32>
    %7 = math.log %6 : vector<16x128xf32>
    %8 = arith.mulf %3, %7 : vector<16x128xf32>
    %cst_4 = arith.constant 1.000000e+00 : f32
    %9 = vector.broadcast %cst_4 : f32 to vector<16x128xf32>
    %10 = arith.subf %9, %3 : vector<16x128xf32>
    %cst_5 = arith.constant 1.000000e+00 : f32
    %11 = vector.broadcast %cst_5 : f32 to vector<16x128xf32>
    %12 = arith.subf %11, %3 : vector<16x128xf32>
    %cst_6 = arith.constant 9.99999968E-21 : f32
    %13 = vector.broadcast %cst_6 : f32 to vector<16x128xf32>
    %14 = arith.addf %12, %13 : vector<16x128xf32>
    %15 = math.log %14 : vector<16x128xf32>
    %16 = arith.mulf %10, %15 : vector<16x128xf32>
    %17 = arith.addf %8, %16 : vector<16x128xf32>
    %cst_7 = arith.constant 0.000000e+00 : f32
    %18 = vector.broadcast %cst_7 : f32 to vector<16x128xf32>
    %19 = arith.subf %18, %17 : vector<16x128xf32>
    %20 = arith.addf %4, %19 : vector<16x128xf32>
    %c0_8 = arith.constant 0 : index
    %c0_9 = arith.constant 0 : index
    %21 = vector.load %arg4[%c0_8, %c0_9] : memref<16x128xf32, #tpu.memory_space<vmem>>, vector<16x128xf32>
    tpu.vector_store %arg4[%c0_8, %c0_9], %20 {strides = array<i32>} : memref<16x128xf32, #tpu.memory_space<vmem>>, vector<16x128xf32>,
    %c0_i32_10 = arith.constant 0 : i32
    %22 = arith.cmpi eq, %arg1, %c0_i32_10 : i32
    %23 = arith.extui %22 : i1 to i32
    %c0_i32_11 = arith.constant 0 : i32
    %24 = arith.cmpi ne, %23, %c0_i32_11 : i32
    scf.if %24 {
      %c0_12 = arith.constant 0 : index
      %c0_13 = arith.constant 0 : index
      %25 = vector.load %arg4[%c0_12, %c0_13] : memref<16x128xf32, #tpu.memory_space<vmem>>, vector<16x128xf32>
      %26 = vector.shape_cast %25 : vector<16x128xf32> to vector<2x8x128xf32>
      %cst_14 = arith.constant dense<0.000000e+00> : vector<8x128xf32>
      %27 = vector.multi_reduction <add>, %26, %cst_14 [0] : vector<2x8x128xf32> to vector<8x128xf32>
      %cst_15 = arith.constant 4.8828125E-4 : f32
      %28 = vector.broadcast %cst_15 : f32 to vector<8x128xf32>
      %29 = arith.mulf %27, %28 : vector<8x128xf32>
      %c0_16 = arith.constant 0 : index
      %c0_17 = arith.constant 0 : index
      %30 = vector.load %arg3[%c0_16, %c0_17] : memref<8x128xf32, #tpu.memory_space<vmem>>, vector<8x128xf32>
      tpu.vector_store %arg3[%c0_16, %c0_17], %29 {strides = array<i32>} : memref<8x128xf32, #tpu.memory_space<vmem>>, vector<8x128xf32>,
    } else {
    }
    return
  }
  func.func @transform_0(%arg0: i32, %arg1: i32) -> (i32, i32) {
    %c1_i32 = arith.constant 1 : i32
    %0 = arith.muli %arg0, %c1_i32 : i32
    %1 = arith.addi %0, %arg1 : i32
    %c0_i32 = arith.constant 0 : i32
    %c0_i32_0 = arith.constant 0 : i32
    return %1, %c0_i32 : i32, i32
  }
  func.func @transform_1(%arg0: i32, %arg1: i32) -> (i32, i32) {
    %c0_i32 = arith.constant 0 : i32
    %c0_i32_0 = arith.constant 0 : i32
    return %arg0, %c0_i32 : i32, i32
  }
}

</mosaic_0001>

<bundles_post_ra>
// kernel: tpu_custom_call.1
= control target key start
LH: loop header
LB: loop body
LE: loop exit
PB: predicated region body
PF: predicated region fallthrough
CT: control target
= control target key end

     0   :  { %6 = vsyncpa [#allocation4], 0  ;;  %s186_s0 = inlined_call_operand.hbm [shape: f32[16,128], index: 0, kind: input, shape index: {}]   ;;  %s187_s1 = inlined_call_operand.hbm [shape: f32[8,128], index: 1, kind: output, shape index: {}]  }
   0x1   :  { %7 = vsyncpa [#allocation5], 0  ;;  %s148_s6 = smov [#allocation3]   ;;  %s100_s10 = scalar_lea.hbm %s186_s0, 256 }
   0x2   :  { %s17_s7 = sshll.u32 %s148_s6, 4  ;;  %p101_p0 = scmp.ne.s32.totalorder %s186_s0, %s100_s10  ;;  %s18_s7 = int_to_ptr.vmem [resolvable:$true] %s17_s7 }
   0x3   :  { %p104_p1 = scmp.lt.u32.totalorder %s100_s10, %s186_s0 }
   0x5   :  { %p106_p2 = pnand %p104_p1, %p101_p0 }
   0x7   :  { %109 = shalt.err (!%p106_p2)
}
   0x8   :  { %s110_s15 = scalar_lea.vmem %s18_s7, 256  ;;  %p115_p4 = scmp.lt.s32.totalorder %s18_s7, %s18_s7 }
   0x9   :  { %p111_p3 = scmp.ne.s32.totalorder %s18_s7, %s110_s15  ;;  %p116_p5 = scmp.lt.s32.totalorder %s110_s15, %s110_s15 }
   0xb   :  { %p117_p6 = por %p116_p5, %p115_p4 }
   0xd   :  { %p118_p7 = pnand %p117_p6, %p111_p3 }
   0xf   :  { %121 = shalt.err (!%p118_p7)
}
  0x10   :  { %s149_s16 = smov 128   ;;  %s150_s17 = smov 8  }
  0x11   :  { %23 = dma.hbm_to_vmem [thread:$0]  %s186_s0, 256, %s18_s7, [#allocation4], %s149_s16, %s149_s16, %s150_s17  }
  0x12   :  { %144 = dma.done.wait [#allocation4], 256  }
  0x13   :  { %145 = vsyncadd [#allocation4], 4294967040  ;;  %v35_v0 = vld [vmem:[#allocation3] sm:$0xff]  ;;  %v36_v1 = vld [vmem:[#allocation3 + $0x8] sm:$0xff]  ;;  %s151_s0 = smov [#allocation6]  }
  0x14   :  { %v39_v2 = vadd.f32 1e-20, %v35_v0  ;;  %v40_v3 = vadd.f32 1e-20, %v36_v1  ;;  %v47_v4 = vsub.f32 1.0, %v35_v0  ;;  %v48_v5 = vsub.f32 1.0, %v36_v1 }
  0x15   :  { %s79_s20 = sshll.u32 %s151_s0, 4  ;;  %s80_s20 = int_to_ptr.vmem [resolvable:$true] %s79_s20 }
  0x16   :  { %92 = vlog2.f32 %v39_v2  ;;  %v49_v6 = vadd.f32 1e-20, %v47_v4  ;;  %v50_v7 = vadd.f32 1e-20, %v48_v5  ;;  %s122_s21 = scalar_lea.vmem %s80_s20, 128  ;;  %p127_p9 = scmp.lt.s32.totalorder %s80_s20, %s80_s20 }
  0x17   :  { %94 = vlog2.f32 %v40_v3  ;;  %p123_p8 = scmp.ne.s32.totalorder %s80_s20, %s122_s21  ;;  %p128_p10 = scmp.lt.s32.totalorder %s122_s21, %s122_s21 }
  0x18   :  { %96 = vlog2.f32 %v49_v6 }
  0x19   :  { %98 = vlog2.f32 %v50_v7  ;;  %p129_p11 = por %p128_p10, %p127_p9 }
  0x1b   :  { %p130_p12 = pnand %p129_p11, %p123_p8 }
  0x20   :  { %v93_v8 = vpop.eup %92 }
  0x21   :  { %v95_v9 = vpop.eup %94  ;;  %v42_v10 = vmul.f32 0.6931472, %v93_v8 }
  0x22   :  { %v97_v11 = vpop.eup %96  ;;  %v44_v12 = vmul.f32 0.6931472, %v95_v9 }
  0x23   :  { %v99_v13 = vpop.eup %98  ;;  %v45_v14 = vmul.f32 %v42_v10, %v35_v0  ;;  %v52_v15 = vmul.f32 0.6931472, %v97_v11 }
  0x24   :  { %v46_v16 = vmul.f32 %v44_v12, %v36_v1  ;;  %v54_v17 = vmul.f32 0.6931472, %v99_v13 }
  0x25   :  { %v55_v18 = vmul.f32 %v52_v15, %v47_v4 }
  0x26   :  { %v56_v19 = vmul.f32 %v54_v17, %v48_v5 }
  0x27   :  { %v57_v20 = vadd.f32 %v55_v18, %v45_v14 }
  0x28   :  { %v58_v21 = vadd.f32 %v56_v19, %v46_v16 }
  0x29   :  { %v59_v22 = vsub.f32 0.0, %v57_v20 }
  0x2a   :  { %v60_v23 = vsub.f32 0.0, %v58_v21 }
  0x2c   :  { %v70_v24 = vadd.f32 %v60_v23, %v59_v22 }
  0x2e   :  { %v71_v25 = vmul.f32 0.00048828125, %v70_v24 }
  0x30   :  { %72 = vst [vmem:[#allocation6] sm:$0xff] %v71_v25 }
  0x31   :  { %133 = shalt.err (!%p130_p12)
}
  0x32   :  { %s134_s24 = scalar_lea.hbm %s187_s1, 128 }
  0x33   :  { %p135_p13 = scmp.ne.s32.totalorder %s187_s1, %s134_s24  ;;  %p138_p0 = scmp.lt.u32.totalorder %s134_s24, %s187_s1 }
  0x35   :  { %p140_p1 = pnand %p138_p0, %p135_p13 }
  0x37   :  { %143 = shalt.err (!%p140_p1)
}
  0x38   :  { %82 = dma.vmem_to_hbm [thread:$0]  %s80_s20, 128, %s187_s1, [#allocation5]  }
  0x39   :  { %146 = dma.done.wait [#allocation5], 128  }
  0x3a   :  { %147 = vsyncadd [#allocation5], 4294967168 }
  0x3b   :  { %86 = vsyncpa [#allocation4], 1 }
  0x3c   :  { %87 = vsyncpa [#allocation5], 1 }

</bundles_post_ra>
